<compile_context>
chip_gen: v7x
topology: tpu7x:2x2x1
jax: 0.10.0
libtpu: 0.0.40
codegen_flags: <defaults>
</compile_context>

<pallas_src>
import functools

import jax
import jax.numpy as jnp
from jax.experimental import pallas as pl
from jax.experimental.pallas import tpu as pltpu


def _mlp_gate(pooled, w1t_ref, b1_ref, w2t_ref, b2_ref):
    """Excitation MLP: (TB, C) f32 pooled means -> (TB, C) f32 sigmoid gate."""
    h = jnp.dot(pooled, w1t_ref[...], preferred_element_type=jnp.float32) + b1_ref[...]
    h = jnp.maximum(h, 0.0)
    g = jnp.dot(h, w2t_ref[...], preferred_element_type=jnp.float32) + b2_ref[...]
    return jax.nn.sigmoid(g)


def _se_fused_kernel(x_ref, w1t_ref, b1_ref, w2t_ref, b2_ref, o_ref, *, inv_hw):
    # x_ref/o_ref: (TB, C, HW) in the input dtype (C on sublanes, HW on lanes).
    # Single read of x: pool -> MLP -> scale -> store.  Everything is row-local
    # in the batch dim, so garbage rows of a partial tail batch block only
    # produce garbage output rows, which Pallas drops on store.
    xf = x_ref[...].astype(jnp.float32)
    pooled = jnp.sum(xf, axis=-1) * inv_hw                      # (TB, C) lane reduce
    gate = _mlp_gate(pooled, w1t_ref, b1_ref, w2t_ref, b2_ref)  # (TB, C) f32
    o_ref[...] = (xf * gate[:, :, None]).astype(o_ref.dtype)


def _pool_mlp_kernel(x_ref, w1t_ref, b1_ref, w2t_ref, b2_ref, s_ref, *, hw, inv_hw):
    # Fallback pass 1.  x_ref: (TB, C, THW); s_ref: (TB, C) f32 accumulator
    # resident across the HW (reduction, "arbitrary") grid axis.
    hw_i = pl.program_id(1)
    thw = x_ref.shape[-1]

    @pl.when(hw_i == 0)
    def _():
        s_ref[...] = jnp.zeros_like(s_ref)

    # Mask lanes past the true HW on the (possibly partial) tail tile: OOB
    # VMEM reads are unchecked garbage and must not reach the channel sums.
    lane = jax.lax.broadcasted_iota(jnp.int32, (1, 1, thw), 2)
    xf = jnp.where(lane < hw - hw_i * thw, x_ref[...].astype(jnp.float32), 0.0)
    s_ref[...] += jnp.sum(xf, axis=-1)

    @pl.when(hw_i == pl.num_programs(1) - 1)
    def _():
        s_ref[...] = _mlp_gate(s_ref[...] * inv_hw, w1t_ref, b1_ref, w2t_ref, b2_ref)


def _scale_kernel(s_ref, x_ref, o_ref):
    # Fallback pass 2: rescale a (TB, C, THW) tile by the per-channel gate.
    gate = s_ref[...]                                           # (TB, C) f32
    o_ref[...] = (x_ref[...].astype(jnp.float32) * gate[:, :, None]).astype(o_ref.dtype)


def se_module(x, w1, b1, w2, b2, *, max_block_bytes=None):
    """SE forward matching the PyTorch module (dims=2).

    x: (B, C, H, W); w1: (Cr, C) = fc_1.weight; b1: (Cr,) = fc_1.bias;
    w2: (C, Cr) = fc_2.weight; b2: (C,) = fc_2.bias.
    """
    B, C, H, W = x.shape
    HW = H * W
    Cr = w1.shape[0]
    dtype = x.dtype
    itemsize = jnp.dtype(dtype).itemsize

    # (B, C, H, W) -> (B, C, HW): contiguous reshape, no HBM traffic.
    xr = x.reshape(B, C, HW)

    # Excitation weights: f32, transposed for row-major GEMMs; hidden dim
    # zero-padded to a sublane multiple (padded units: relu(0 + 0) = 0, then
    # zero rows of w2t contribute nothing -> exact).
    Crp = max(8, -(-Cr // 8) * 8)
    w1t = jnp.pad(jnp.transpose(w1).astype(jnp.float32), ((0, 0), (0, Crp - Cr)))
    b1r = jnp.pad(b1.astype(jnp.float32), (0, Crp - Cr)).reshape(1, Crp)
    w2t = jnp.pad(jnp.transpose(w2).astype(jnp.float32), ((0, Crp - Cr), (0, 0)))
    b2r = b2.astype(jnp.float32).reshape(1, C)
    weight_bytes = (C * Crp * 2 + Crp + C) * 4

    # VMEM budget: streaming x blocks are double-buffered for input and output
    # (4x block); whole-array VMEM weights are resident once (not pipelined).
    # Keep the request comfortably under v7x's 64 MiB physical VMEM.
    if max_block_bytes is None:
        max_block_bytes = max(1 << 20, (28 * 1024 * 1024 - weight_bytes) // 4)

    vmem_full = pl.BlockSpec(memory_space=pltpu.MemorySpace.VMEM)
    weight_specs = [vmem_full] * 4
    weight_args = (w1t, b1r, w2t, b2r)

    def vmem_limit(block_bytes):
        need = 4 * block_bytes + weight_bytes + (2 << 20)
        return int(min(64 * 1024 * 1024, max(32 * 1024 * 1024, need)))

    # ---- Fused single-pass path: one (TB, C, HW) slab per grid step. --------
    TB = min(B, 8)
    if B >= 2:                        # >= 2 batch tiles so both v7x TCs get work
        TB = min(TB, -(-B // 2))
    while TB > 1 and TB * C * HW * itemsize > max_block_bytes:
        TB = -(-TB // 2)

    if TB * C * HW * itemsize <= max_block_bytes:
        nb = -(-B // TB)
        block_bytes = TB * C * HW * itemsize
        out = pl.pallas_call(
            functools.partial(_se_fused_kernel, inv_hw=1.0 / float(HW)),
            out_shape=jax.ShapeDtypeStruct((B, C, HW), dtype),
            grid_spec=pltpu.PrefetchScalarGridSpec(
                num_scalar_prefetch=0,
                grid=(nb,),
                in_specs=[pl.BlockSpec((TB, C, HW), lambda b: (b, 0, 0))] + weight_specs,
                out_specs=pl.BlockSpec((TB, C, HW), lambda b: (b, 0, 0)),
            ),
            compiler_params=pltpu.CompilerParams(
                dimension_semantics=("parallel",),
                vmem_limit_bytes=vmem_limit(block_bytes)),
            cost_estimate=pl.CostEstimate(
                flops=int(2 * B * C * HW + 4 * B * C * Crp),
                transcendentals=int(B * C),
                bytes_accessed=int(2 * B * C * HW * itemsize + weight_bytes)),
        )(xr, *weight_args)
        return out.reshape(B, C, H, W)

    # ---- Two-pass fallback: HW tiled in 128-lane multiples, no HBM padding. --
    # TODO(synk): for B <= 8 the pooling pass still runs on a single v7x
    # TensorCore; splitting HW into parallel partial sums would recover it.
    TB = min(B, 8)                    # TB == B (full) or 8 -> legal 2D gate tiles
    rows = max_block_bytes // max(1, TB * C * itemsize)
    if rows >= HW:
        THW = HW
    else:
        THW = min(HW, max(128, (rows // 128) * 128))
    nb, nhw = -(-B // TB), -(-HW // THW)
    block_bytes = TB * C * THW * itemsize

    gate = pl.pallas_call(
        functools.partial(_pool_mlp_kernel, hw=HW, inv_hw=1.0 / float(HW)),
        out_shape=jax.ShapeDtypeStruct((B, C), jnp.float32),
        grid_spec=pltpu.PrefetchScalarGridSpec(
            num_scalar_prefetch=0,
            grid=(nb, nhw),
            in_specs=[pl.BlockSpec((TB, C, THW), lambda b, h: (b, 0, h))] + weight_specs,
            out_specs=pl.BlockSpec((TB, C), lambda b, h: (b, 0)),
        ),
        compiler_params=pltpu.CompilerParams(
            dimension_semantics=("parallel", "arbitrary"),
            vmem_limit_bytes=vmem_limit(block_bytes)),
        cost_estimate=pl.CostEstimate(
            flops=int(B * C * HW + 4 * B * C * Crp),
            transcendentals=int(B * C),
            bytes_accessed=int(B * C * HW * itemsize + B * C * 4 + weight_bytes)),
    )(xr, *weight_args)

    out = pl.pallas_call(
        _scale_kernel,
        out_shape=jax.ShapeDtypeStruct((B, C, HW), dtype),
        grid_spec=pltpu.PrefetchScalarGridSpec(
            num_scalar_prefetch=0,
            grid=(nb, nhw),
            in_specs=[
                pl.BlockSpec((TB, C), lambda b, h: (b, 0)),
                pl.BlockSpec((TB, C, THW), lambda b, h: (b, 0, h)),
            ],
            out_specs=pl.BlockSpec((TB, C, THW), lambda b, h: (b, 0, h)),
        ),
        compiler_params=pltpu.CompilerParams(
            dimension_semantics=("parallel", "parallel"),
            vmem_limit_bytes=vmem_limit(block_bytes)),
        cost_estimate=pl.CostEstimate(
            flops=int(B * C * HW),
            transcendentals=0,
            bytes_accessed=int(2 * B * C * HW * itemsize + B * C * 4)),
    )(gate, xr)
    return out.reshape(B, C, H, W)


def se_reference(x, w1, b1, w2, b2):
    """Pure-JAX reference matching the PyTorch forward (dims=2)."""
    xf = x.astype(jnp.float32)
    pooled = jnp.mean(xf, axis=(2, 3))                      # (B, C)
    h = jnp.maximum(pooled @ w1.T + b1, 0.0)
    s = jax.nn.sigmoid(h @ w2.T + b2)
    return (xf * s[:, :, None, None]).astype(x.dtype)


if __name__ == "__main__":
    def run_case(B, C, H, W, reduction, key, atol, rtol, **kw):
        Cr = max(1, C // reduction)
        kx, k1, k2, k3, k4 = jax.random.split(key, 5)
        x = jax.random.normal(kx, (B, C, H, W), dtype=jnp.float32)
        w1 = 0.1 * jax.random.normal(k1, (Cr, C), dtype=jnp.float32)   # fc_1.weight
        b1 = 0.1 * jax.random.normal(k2, (Cr,), dtype=jnp.float32)     # fc_1.bias
        w2 = 0.1 * jax.random.normal(k3, (C, Cr), dtype=jnp.float32)   # fc_2.weight
        b2 = 0.1 * jax.random.normal(k4, (C,), dtype=jnp.float32)      # fc_2.bias

        out = jax.block_until_ready(se_module(x, w1, b1, w2, b2, **kw))
        ref = se_reference(x, w1, b1, w2, b2)
        assert out.shape == (B, C, H, W)
        err = float(jnp.max(jnp.abs(out - ref)))
        assert jnp.allclose(out, ref, atol=atol, rtol=rtol), err

    key = jax.random.PRNGKey(0)
    k0, k1, k2 = jax.random.split(key, 3)

    # Small spec shape (fused path, TB=1 so the batch grid has 2 parallel steps).
    run_case(B=2, C=4, H=16, W=16, reduction=4, key=k0, atol=1e-5, rtol=1e-5)
    # Realistic SE shape: C=128, HW=49 (fused path, partial tail batch block).
    # Looser tolerance guards against MXU f32 precision-mode differences.
    run_case(B=3, C=128, H=7, W=7, reduction=4, key=k1, atol=2e-3, rtol=2e-3)
    # Force the two-pass fallback with a tiny block budget so the HW-tiled
    # reduction (128-lane tiles, masked tail at HW=144) is exercised as well.
    run_case(B=2, C=32, H=12, W=12, reduction=4, key=k2, atol=2e-3, rtol=2e-3,
             max_block_bytes=16 * 1024)

    print("KERNEL_OK")
</pallas_src>

<mosaic_0001>
module attributes {stable_mosaic.version = 11 : i64} {
  func.func @_se_fused_kernel(%arg0: i32, %arg1: memref<1x4x256xf32, #tpu.memory_space<vmem>>, %arg2: memref<4x8xf32, #tpu.memory_space<vmem>>, %arg3: memref<1x8xf32, #tpu.memory_space<vmem>>, %arg4: memref<8x4xf32, #tpu.memory_space<vmem>>, %arg5: memref<1x4xf32, #tpu.memory_space<vmem>>, %arg6: memref<1x4x256xf32, #tpu.memory_space<vmem>>) attributes {dimension_semantics = [#tpu.dimension_semantics<parallel>], iteration_bounds = array<i64: 2>, scalar_prefetch = 0 : i64, scratch_operands = 0 : i64, tpu.core_type = #tpu.core_type<tc>, window_params = [{transform_indices = @transform_0, window_bounds = array<i64: 1, 4, 256>}, {pipeline_mode = #tpu.pipeline_mode<synchronous>, transform_indices = @transform_1, window_bounds = array<i64: 4, 8>}, {pipeline_mode = #tpu.pipeline_mode<synchronous>, transform_indices = @transform_2, window_bounds = array<i64: 1, 8>}, {pipeline_mode = #tpu.pipeline_mode<synchronous>, transform_indices = @transform_3, window_bounds = array<i64: 8, 4>}, {pipeline_mode = #tpu.pipeline_mode<synchronous>, transform_indices = @transform_4, window_bounds = array<i64: 1, 4>}, {transform_indices = @transform_5, window_bounds = array<i64: 1, 4, 256>}]} {
    %c0 = arith.constant 0 : index
    %c0_0 = arith.constant 0 : index
    %c0_1 = arith.constant 0 : index
    %0 = vector.load %arg1[%c0, %c0_0, %c0_1] : memref<1x4x256xf32, #tpu.memory_space<vmem>>, vector<1x4x256xf32>
    %cst = arith.constant dense<0.000000e+00> : vector<1x4xf32>
    %1 = vector.multi_reduction <add>, %0, %cst [2] : vector<1x4x256xf32> to vector<1x4xf32>
    %cst_2 = arith.constant 3.906250e-03 : f32
    %2 = vector.broadcast %cst_2 : f32 to vector<1x4xf32>
    %3 = arith.mulf %1, %2 : vector<1x4xf32>
    %c0_3 = arith.constant 0 : index
    %c0_4 = arith.constant 0 : index
    %4 = vector.load %arg2[%c0_3, %c0_4] : memref<4x8xf32, #tpu.memory_space<vmem>>, vector<4x8xf32>
    %cst_5 = arith.constant dense<0.000000e+00> : vector<1x8xf32>
    %5 = tpu.matmul %3, %4, %cst_5 {dimension_numbers = #tpu.dot_dimension_numbers<[1], [0], [0], [1], [0, 0, 1, 1], [], []>} : vector<1x4xf32>, vector<4x8xf32>, vector<1x8xf32> -> vector<1x8xf32>
    %c0_6 = arith.constant 0 : index
    %c0_7 = arith.constant 0 : index
    %6 = vector.load %arg3[%c0_6, %c0_7] : memref<1x8xf32, #tpu.memory_space<vmem>>, vector<1x8xf32>
    %7 = arith.addf %5, %6 : vector<1x8xf32>
    %cst_8 = arith.constant 0.000000e+00 : f32
    %8 = vector.broadcast %cst_8 : f32 to vector<1x8xf32>
    %9 = arith.maximumf %7, %8 : vector<1x8xf32>
    %c0_9 = arith.constant 0 : index
    %c0_10 = arith.constant 0 : index
    %10 = vector.load %arg4[%c0_9, %c0_10] : memref<8x4xf32, #tpu.memory_space<vmem>>, vector<8x4xf32>
    %cst_11 = arith.constant dense<0.000000e+00> : vector<1x4xf32>
    %11 = tpu.matmul %9, %10, %cst_11 {dimension_numbers = #tpu.dot_dimension_numbers<[1], [0], [0], [1], [0, 0, 1, 1], [], []>} : vector<1x8xf32>, vector<8x4xf32>, vector<1x4xf32> -> vector<1x4xf32>
    %c0_12 = arith.constant 0 : index
    %c0_13 = arith.constant 0 : index
    %12 = vector.load %arg5[%c0_12, %c0_13] : memref<1x4xf32, #tpu.memory_space<vmem>>, vector<1x4xf32>
    %13 = arith.addf %11, %12 : vector<1x4xf32>
    %14 = arith.negf %13 : vector<1x4xf32>
    %15 = math.exp %14 : vector<1x4xf32>
    %cst_14 = arith.constant 1.000000e+00 : f32
    %16 = vector.broadcast %cst_14 : f32 to vector<1x4xf32>
    %17 = arith.addf %16, %15 : vector<1x4xf32>
    %18 = arith.divf %16, %17 : vector<1x4xf32>
    %19 = vector.shape_cast %18 : vector<1x4xf32> to vector<1x4x1xf32>
    %20 = vector.broadcast %19 : vector<1x4x1xf32> to vector<1x4x256xf32>
    %21 = arith.mulf %0, %20 : vector<1x4x256xf32>
    %c0_15 = arith.constant 0 : index
    %c0_16 = arith.constant 0 : index
    %c0_17 = arith.constant 0 : index
    %22 = vector.load %arg6[%c0_15, %c0_16, %c0_17] : memref<1x4x256xf32, #tpu.memory_space<vmem>>, vector<1x4x256xf32>
    tpu.vector_store %arg6[%c0_15, %c0_16, %c0_17], %21 {strides = array<i32>} : memref<1x4x256xf32, #tpu.memory_space<vmem>>, vector<1x4x256xf32>,
    return
  }
  func.func @transform_0(%arg0: i32) -> (i32, i32, i32) {
    %c0_i32 = arith.constant 0 : i32
    %c0_i32_0 = arith.constant 0 : i32
    %c0_i32_1 = arith.constant 0 : i32
    return %arg0, %c0_i32, %c0_i32_0 : i32, i32, i32
  }
  func.func @transform_1(%arg0: i32) -> (i32, i32) {
    %c0_i32 = arith.constant 0 : i32
    %c0_i32_0 = arith.constant 0 : i32
    %c0_i32_1 = arith.constant 0 : i32
    return %c0_i32, %c0_i32_0 : i32, i32
  }
  func.func @transform_2(%arg0: i32) -> (i32, i32) {
    %c0_i32 = arith.constant 0 : i32
    %c0_i32_0 = arith.constant 0 : i32
    %c0_i32_1 = arith.constant 0 : i32
    return %c0_i32, %c0_i32_0 : i32, i32
  }
  func.func @transform_3(%arg0: i32) -> (i32, i32) {
    %c0_i32 = arith.constant 0 : i32
    %c0_i32_0 = arith.constant 0 : i32
    %c0_i32_1 = arith.constant 0 : i32
    return %c0_i32, %c0_i32_0 : i32, i32
  }
  func.func @transform_4(%arg0: i32) -> (i32, i32) {
    %c0_i32 = arith.constant 0 : i32
    %c0_i32_0 = arith.constant 0 : i32
    %c0_i32_1 = arith.constant 0 : i32
    return %c0_i32, %c0_i32_0 : i32, i32
  }
  func.func @transform_5(%arg0: i32) -> (i32, i32, i32) {
    %c0_i32 = arith.constant 0 : i32
    %c0_i32_0 = arith.constant 0 : i32
    %c0_i32_1 = arith.constant 0 : i32
    return %arg0, %c0_i32, %c0_i32_0 : i32, i32, i32
  }
}

</mosaic_0001>

<bundles_post_ra>
// kernel: tpu_custom_call.1
= control target key start
LH: loop header
LB: loop body
LE: loop exit
PB: predicated region body
PF: predicated region fallthrough
CT: control target
= control target key end

     0   :  { %10 = vsyncpa [#allocation3], 0  ;;  %s921_s0 = inlined_call_operand.hbm [shape: f32[2,4,256], index: 0, kind: input, shape index: {}]   ;;  %s922_s1 = inlined_call_operand.vmem [shape: f32[4,8], index: 1, kind: input, shape index: {}]   ;;  %s923_s2 = inlined_call_operand.vmem [shape: f32[1,8], index: 2, kind: input, shape index: {}]   ;;  %s924_s3 = inlined_call_operand.vmem [shape: f32[8,4], index: 3, kind: input, shape index: {}]   ;;  %s925_s4 = inlined_call_operand.vmem [shape: f32[1,4], index: 4, kind: input, shape index: {}]   ;;  %s926_s5 = inlined_call_operand.hbm [shape: f32[2,4,256], index: 5, kind: output, shape index: {}]  }
   0x1   :  { %12 = vsyncpa [#allocation3 + $0x1], 0 }
   0x2   :  { %13 = vsyncpa [#allocation4], 0 }
   0x3   :  { %15 = vsyncpa [#allocation4 + $0x1], 0  ;;  %s744_s18 = smov 0   ;;  %s746_s19 = smov 0  }
   0x4   :  { %s748_s20 = smov 0   ;;  %s750_s21 = smov 0  }
   0x5 LB: > { %s765_s22 = sadd.s32 4294967295, %s707_s21   ;;  %s523_s23 = sadd.s32 4294967294, %s707_s21   ;;  %s707_s21 = sphi %s750_s21, %s941_s21   ;;  %s703_s20 = sphi %s748_s20, %s940_s20   ;;  %s699_s19 = sphi %s746_s19, %s939_s19   ;;  %s695_s18 = sphi %s744_s18, %s938_s18  }
   0x6   : > { %s769_s24 = sadd.s32 1, %s707_s21   ;;  %s28_s25 = sadd.s32 1, %s703_s20 }
   0x7   : > { %s25_s26 = ssub.s32 %s707_s21, %s769_s24  ;;  %p35_p0 = scmp.ne.s32.totalorder %s703_s20, %s699_s19 }
   0x8   : > { %p26_p1 = scmp.eq.s32.totalorder %s25_s26, 0  ;;  %p36_p2 = scmp.eq.s32.totalorder %s707_s21, 0 }
   0x9   : > { %p41_p3 = scmp.ne.s32.totalorder %s699_s19, %s695_s18  ;;  %p42_p4 = scmp.eq.s32.totalorder %s765_s22, 0 }
   0xa   : > { %s781_s27 = scalar_select %p26_p1, %s703_s20, %s28_s25  }
   0xb   : > { %p783_p5 = por %p36_p2, %p35_p0  ;;  %p787_p6 = por %p42_p4, %p41_p3 }
   0xc   : > { %p149_p7 = scmp.eq.s32.totalorder %s765_s22, 1  ;;  %p155_p8 = scmp.eq.s32.totalorder %s523_s23, 1 }
   0xd   : > { %p569_p10 = scmp.lt.s32.totalorder %s707_s21, 2  ;;  %s187_s7 = sand.u32 1, %s703_s20  }
   0xe   : > { %p794_p11 = por %p149_p7, %p35_p0  ;;  %p798_p12 = por %p155_p8, %p41_p3 }
   0xf   : > { %s541_s8 = sshll.u32 %s707_s21, 7  ;;  %s526_s9 = sshll.u32 %s187_s7, 3 }
  0x10   : > { %s930_s30 = scalar_select %p794_p11, 1, 0 }
  0x11   : > { %s931_s6 = scalar_select %p798_p12, 1, 0 }
  0x12   : > { %s807_s12 = scalar_lea.hbm %s921_s0, %s541_s8  ;;  %s191_s13 = scalar_lea.vmem [#allocation2], %s526_s9 }
  0x13   : > { %s199_s14 = sshll.u32 %s191_s13, 4  ;;  %p811_p13 = pnand %p569_p10, %p783_p5  ;;  %s815_s14 = int_to_ptr.vmem [resolvable:$true] %s199_s14 }
  0x14   : > { %s188_s16 = scalar_lea.sflag [#allocation3], %s187_s7  ;;  %s611_s17 = scalar_lea.hbm %s807_s12, 128 }
  0x15   : > { %p612_p2 = scmp.ne.s32.totalorder %s807_s12, %s611_s17  ;;  %p613_p3 = pneg %p811_p13 }
  0x16   : > { %s616_s26 = scalar_lea.hbm %s921_s0, 256  ;;  %p617_p5 = scmp.lt.u32.totalorder %s807_s12, %s921_s0 }
  0x17   : > { %p614_p4 = pnand %p613_p3, %p612_p2  ;;  %p618_p8 = scmp.lt.u32.totalorder %s616_s26, %s611_s17 }
  0x18   : > { %p620_p9 = scmp.lt.u32.totalorder %s611_s17, %s807_s12 }
  0x19   : > { %p615_p7 = pneg %p614_p4  ;;  %p619_p10 = por %p618_p8, %p617_p5 }
  0x1b   : > { %p621_p0 = por %p620_p9, %p619_p10 }
  0x1d   : > { %p622_p1 = pnand %p621_p0, %p615_p7 }
  0x1f   : > { %625 = shalt.err (!%p622_p1)
}
  0x20   : > { %s626_s7 = scalar_lea.vmem %s815_s14, 128  ;;  %s709_s9 = smov [#allocation2]  }
  0x21   : > { %p627_p2 = scmp.ne.s32.totalorder %s815_s14, %s626_s7  ;;  %s631_s10 = sshll.u32 %s709_s9, 4  ;;  %s632_s10 = int_to_ptr.vmem [resolvable:$false] %s631_s10 }
  0x22   : > { %s633_s11 = scalar_lea.vmem %s632_s10, 256  ;;  %p634_p11 = scmp.lt.s32.totalorder %s815_s14, %s632_s10 }
  0x23   : > { %p629_p4 = pnand %p627_p2, %p613_p3  ;;  %p635_p5 = scmp.lt.s32.totalorder %s633_s11, %s626_s7 }
  0x25   : > { %p630_p12 = pneg %p629_p4  ;;  %p636_p8 = por %p635_p5, %p634_p11 }
  0x27   : > { %p637_p9 = pnand %p636_p8, %p630_p12 }
  0x29   : > { %640 = shalt.err (!%p637_p9)
}
  0x2a   : > { %564 = dma.hbm_to_vmem [thread:$0]  (!%p811_p13), %s807_s12, 128, %s815_s14, %s188_s16  }
  0x2b   : > { %p933_p0 = scmp.lt.s32.totalorder %s707_s21, 3  ;;  %p934_p1 = scmp.ge.s32.totalorder %s707_s21, 1 }
  0x2d   : > { %p205_p3 = pnand %p934_p1, %p933_p0 }
  0x2e   : > { %s849_s13 = sand.u32 (!%p205_p3), 1, %s699_s19  }
  0x2f   : > { %208 = sbr.rel (%p205_p3) target bundleno = 798 (0x31e), region = 40  ;;  %s530_s17 = sshll.u32 (!%p205_p3), %s849_s13, 3 }
  0x30   : > { %s211_s23 = scalar_lea.sflag (!%p205_p3), [#allocation3], %s849_s13  ;;  %s214_s15 = scalar_lea.vmem (!%p205_p3), [#allocation2], %s530_s17 }
  0x36   : > { %686 = dma.done.wait (%p787_p6), %s211_s23, 128  }
  0x37   : > { %688 = vsyncadd (%p787_p6), %s211_s23, 4294967168  ;;  %vm245_vm0 = vcmask 1043456   ;;  %v241_v0 = vld [vmem:[%s214_s15] sm:$0xff]  ;;  %v710_v5 = vmov 0.0   ;;  %vm711_vm1 = vmmov 0   ;;  %v255_v7 = vlaneseq  ;;  %s542_s7 = sshll.u32 %s765_s22, 7 }
  0x38   : > { %v243_v1 = vcombine.high %v241_v0, %v241_v0  ;;  %v246_v2 = vsel %vm245_vm0, %v241_v0, 0.0  ;;  %547 = vmatprep.subr.mxu0 %v710_v5  ;;  %v252_v6 = vld [vmem:[%s922_s1] sm:$0xf]  ;;  %552 = vmatprep.subr.mxu1 %v710_v5  ;;  %vm261_vm2 = vcmask 31744   ;;  %vm340_vm3 = vcmask 64512   ;;  %s240_s9 = scalar_lea.vmem [#allocation5], %s530_s17  ;;  %s877_s15 = scalar_lea.hbm %s926_s5, %s542_s7 }
  0x39   : > { %548 = vmatpush3.msk.msra.mxu0 %vm245_vm0, %v252_v6  ;;  %549 = vmatprep.mubr.msk.f32.mxu0 %vm711_vm1, %v710_v5  ;;  %v256_v8 = vand.u32 127, %v255_v7  ;;  %v258_v9 = vshrl.u32 %v255_v7, 7  ;;  %v338_v14 = vld [vmem:[%s924_s3] sm:$0xff]  ;;  %v712_v30 = vmov 839922192   ;;  %s453_s10 = sshll.u32 %s240_s9, 4  ;;  %s879_s10 = int_to_ptr.vmem [resolvable:$true] %s453_s10 }
  0x3a   : > { %v247_v3 = vsel %vm245_vm0, %v243_v1, 0.0  ;;  %554 = vmatprep.mubr.msk.f32.mxu1 %vm711_vm1, %v710_v5  ;;  %553 = vmatpush3.msra.mxu1 %v338_v14  ;;  %v253_v15 = vld [vmem:[%s923_s2] sm:$0x1]  ;;  %v429_v31 = vunpack.c.l.s4 %v712_v30  ;;  %s439_s12 = scalar_lea.sflag [#allocation4], %s849_s13  ;;  %s641_s14 = scalar_lea.vmem %s879_s10, 128 }
  0x3b   : > { %v248_v4 = vadd.f32 %v247_v3, %v246_v2  ;;  %v259_v10 = vsub.s32 %v256_v8, %v258_v9  ;;  %v339_v20 = vld [vmem:[%s925_s4] sm:$0x1]  ;;  %v422_v27 = vsub.s32 0, %v258_v9  ;;  %p642_p6 = scmp.ne.s32.totalorder %s879_s10, %s641_s14  ;;  %p935_p11 = scmp.ne.s32.totalorder %s930_s30, 0 }
  0x3c   : > { %v430_v32 = vunpack.c.0.s8 %v429_v31  ;;  %s713_s22 = smov [#allocation5]  }
  0x3d   : > { %249 = vadd.xlane.f32.xlu0 %v248_v4  ;;  %p643_p12 = pnand %p642_p6, %p935_p11  ;;  %s645_s17 = sshll.u32 %s713_s22, 4  ;;  %s646_s17 = int_to_ptr.vmem [resolvable:$false] %s645_s17 }
  0x3e   : > { %v433_v33 = vsub.s32 %v430_v32, %v258_v9  ;;  %s647_s29 = scalar_lea.vmem %s646_s17, 256  ;;  %p648_p7 = scmp.lt.s32.totalorder %s879_s10, %s646_s17 }
  0x3f   : > { %p644_p13 = pneg %p643_p12  ;;  %p649_p10 = scmp.lt.s32.totalorder %s647_s29, %s641_s14 }
  0x41   : > { %p650_p2 = por %p649_p10, %p648_p7 }
  0x43   : > { %p651_p4 = pnand %p650_p2, %p644_p13 }
  0xca   : > { %v250_v11 = vpop.xlane.xlu0 %249 }
  0xcb   : > { %v251_v12 = vmul.f32 0.00390625, %v250_v11 }
  0xcd   : > { %v260_v13 = vrot.slane %v251_v12, %v259_v10 }
  0xcf   : > { %550 = vmatmul.mubr.msk.f32.vlgmr.msra.gmra.mrb[0].mxu0 %vm261_vm2, %v260_v13 }
 0x1a2   : > { %v333_v16 = vpop.f32.mrb[0].mxu0 }
 0x1a3   : > { %v334_v17 = vadd.f32 %v333_v16, %v253_v15  ;;  %v551_v18 = vpop.f32.mrb[1].mxu0 }
 0x1a5   : > { %v337_v19 = vmax.f32 %v334_v17, 0.0 }
 0x1a7   : > { %555 = vmatmul.mubr.msk.f32.vlgmr.msra.gmra.mrb[0].mxu1 %vm340_vm3, %v337_v19 }
 0x27a   : > { %v410_v21 = vpop.f32.mrb[0].mxu1 }
 0x27b   : > { %v411_v22 = vadd.f32 %v410_v21, %v339_v20  ;;  %v556_v23 = vpop.f32.mrb[1].mxu1 }
 0x27d   : > { %v535_v24 = vmul.f32 -1.442695, %v411_v22 }
 0x27f   : > { %607 = vpow2.f32 %v535_v24 }
 0x289   : > { %v608_v25 = vpop.eup %607 }
 0x28a   : > { %v417_v26 = vadd.f32 1.0, %v608_v25 }
 0x28c   : > { %609 = vrcp.f32 %v417_v26 }
 0x296   : > { %v610_v28 = vpop.eup %609 }
 0x297   : > { %v423_v29 = vrot.slane %v610_v28, %v422_v27 }
 0x299   : > { %425 = vbcast.lane.b32.xlu0 %v423_v29, 256 }
 0x30b   : > { %v426_v34 = vpop.permute.xlu0 %425 }
 0x30c   : > { %v434_v35 = vrot.slane %v426_v34, %v433_v33 }
 0x30e   : > { %v436_v36 = vmul.f32 %v434_v35, %v241_v0 }
 0x310   : > { %437 = vst [vmem:[%s240_s9] sm:$0xff] %v436_v36 }
 0x311   : > { %654 = shalt.err (!%p651_p4)
}
 0x312   : > { %s655_s13 = scalar_lea.hbm %s877_s15, 128  ;;  %s659_s26 = scalar_lea.hbm %s926_s5, 256 }
 0x313   : > { %p656_p5 = scmp.ne.s32.totalorder %s877_s15, %s655_s13  ;;  %p660_p0 = scmp.lt.u32.totalorder %s877_s15, %s926_s5 }
 0x314   : > { %p661_p1 = scmp.lt.u32.totalorder %s659_s26, %s655_s13  ;;  %p663_p6 = scmp.lt.u32.totalorder %s655_s13, %s877_s15 }
 0x315   : > { %p657_p8 = pnand %p656_p5, %p935_p11 }
 0x316   : > { %p662_p3 = por %p661_p1, %p660_p0 }
 0x317   : > { %p658_p9 = pneg %p657_p8 }
 0x318   : > { %p664_p12 = por %p663_p6, %p662_p3 }
 0x31a   : > { %p665_p13 = pnand %p664_p12, %p658_p9 }
 0x31c   : > { %668 = shalt.err (!%p665_p13)
}
 0x31d   : > { %559 = dma.vmem_to_hbm [thread:$0]  (%p935_p11), %s879_s10, 128, %s877_s15, %s439_s12  }
 0x31e PF: > { %s465_s7 = sand.u32 1, %s695_s18   ;;  %p936_p7 = scmp.ne.s32.totalorder %s931_s6, 0 }
 0x31f   : > { %p937_p10 = scmp.ge.s32.totalorder %s707_s21, 2  ;;  %s466_s9 = scalar_lea.sflag [#allocation4], %s465_s7 }
 0x321   : > { %p566_p2 = pnand %p937_p10, %p936_p7 }
 0x323   : > { %690 = dma.done.wait (!%p566_p2), %s466_s9, 128  }
 0x324   : > { %692 = vsyncadd (!%p566_p2), %s466_s9, 4294967168  ;;  %p18_p4 = scmp.ge.s32.totalorder %s769_s24, 4   ;;  %s938_s18 = smov %s699_s19 }
 0x325   : > { %s939_s19 = smov %s703_s20  ;;  %s940_s20 = smov %s781_s27 }
 0x326   : > { %s941_s21 = smov %s769_s24  ;;  %20 = sbr.rel (!%p18_p4) target bundleno = 5 (0x5), region = 85 }
 0x32d   :  { %471 = vsyncpa [#allocation3], 1 }
 0x32e   :  { %473 = vsyncpa [#allocation3 + $0x1], 1 }
 0x32f   :  { %474 = vsyncpa [#allocation4], 1 }
 0x330   :  { %476 = vsyncpa [#allocation4 + $0x1], 1 }

</bundles_post_ra>
